<compile_context>
chip_gen: v7x
topology: tpu7x:2x2x1
jax: 0.10.0
libtpu: 0.0.40
codegen_flags: <defaults>
</compile_context>

<pallas_src>
import functools

import jax
import jax.numpy as jnp
from jax.experimental import pallas as pl
from jax.experimental.pallas import tpu as pltpu


def _round_up(x, m):
    return ((x + m - 1) // m) * m


def _cdiv(a, b):
    return -(-a // b)


def _default_pack():
    """Rows packed per lane-dense row: 4 (128 lanes) on v5e-, 8 (256) on v6e/v7x."""
    try:
        kind = jax.devices()[0].device_kind.lower()
    except Exception:
        return 4
    if any(v in kind for v in ("v2", "v3", "v4", "v5")):
        return 4
    return 8


# ----------------------------------------------------------------------------
# Kernel: one batch tile of the full forward (to_hidden -> hidden* -> head),
# operating on row-packed, lane-dense activations.
# ----------------------------------------------------------------------------
def _repr_model_kernel(h_ref, e_ref,
                       w0h_ref, w0e_ref, b0_ref,      # to_hidden (row-split, block-diag)
                       wh_ref, bh_ref,                # stacked hidden layers (block-diag)
                       wout_ref, bout_ref,            # from_hidden (block-diag)
                       out_ref,
                       *, n_hidden, z_dim, out_dim, min_std):
    bf16 = jnp.bfloat16

    # to_hidden: concat([h, e], 1) @ W0  ==  h @ W0[:h_dim] + e @ W0[h_dim:]
    acc = jnp.dot(h_ref[...].astype(bf16), w0h_ref[...],
                  preferred_element_type=jnp.float32)
    acc = acc + jnp.dot(e_ref[...].astype(bf16), w0e_ref[...],
                        preferred_element_type=jnp.float32)
    act = jnp.maximum(acc + b0_ref[...], 0.0)

    # hidden: (n_ff_layers - 1) x (Linear + ReLU), statically unrolled
    for l in range(n_hidden):
        acc = jnp.dot(act.astype(bf16), wh_ref[l],
                      preferred_element_type=jnp.float32)
        act = jnp.maximum(acc + bh_ref[l], 0.0)

    # from_hidden: single lane-dense matmul producing P packed [mu | pre_std] groups
    y = jnp.dot(act.astype(bf16), wout_ref[...],
                preferred_element_type=jnp.float32) + bout_ref[...]

    # Per packed group of out_dim lanes: first z_dim lanes = mu,
    # remaining z_dim lanes = softplus(pre_std + 0.55) + min_std.
    col = jax.lax.broadcasted_iota(jnp.int32, y.shape, dimension=1)
    if out_dim & (out_dim - 1) == 0:        # power of two: cheap bitwise mod
        lane_in_group = jnp.bitwise_and(col, out_dim - 1)
    else:
        lane_in_group = col % out_dim
    std = jax.nn.softplus(y + 0.55) + min_std
    out_ref[...] = jnp.where(lane_in_group < z_dim, y, std).astype(out_ref.dtype)


# ----------------------------------------------------------------------------
# Wrapper: row-pack inputs, batch-tiled grid, resident block-diag weights,
# lane-dense output.  Returns (mu, std) — parameters of Independent(Normal).
# ----------------------------------------------------------------------------
def repr_model_forward(h_state, encoded_obs, weights, *, min_std):
    P = weights["pack"]
    h_dim, feat_dim, z_dim = weights["h_dim"], weights["feat_dim"], weights["z_dim"]
    out_dim = 2 * z_dim
    n_hidden = weights["n_hidden"]
    w0h, w0e, b0 = weights["w0h"], weights["w0e"], weights["b0"]
    wh, bh = weights["wh"], weights["bh"]
    w_out, b_out = weights["w_out"], weights["b_out"]

    B = h_state.shape[0]

    # --- tiling in packed-row space -----------------------------------------
    R = _cdiv(B, P)                       # packed rows needed
    R8 = _round_up(max(R, 8), 8)          # sublane-aligned
    n_tiles = max(1, _cdiv(R8, 1024))     # target <= 1024 packed rows per tile
    TR = _round_up(_cdiv(R8, n_tiles), 8)
    if n_tiles == 1 and R8 >= 16:         # v7x: >=2 grid steps so both TCs get work
        n_tiles = 2
        TR = _round_up(_cdiv(R8, 2), 8)
    R_p = n_tiles * TR
    Bp = R_p * P

    if Bp != B:
        pad = Bp - B
        h_state = jnp.pad(h_state, ((0, pad), (0, 0)))
        encoded_obs = jnp.pad(encoded_obs, ((0, pad), (0, 0)))

    # Free contiguous views: P consecutive batch rows per lane-dense row.
    h_packed = h_state.reshape(R_p, P * h_dim)
    e_packed = encoded_obs.reshape(R_p, P * feat_dim)

    def resident(a):  # full-array block, constant block index -> stays in VMEM
        nd = a.ndim
        return pl.BlockSpec(a.shape, lambda i, _nd=nd: (0,) * _nd)

    in_specs = [
        pl.BlockSpec((TR, P * h_dim), lambda i: (i, 0)),
        pl.BlockSpec((TR, P * feat_dim), lambda i: (i, 0)),
        resident(w0h), resident(w0e), resident(b0),
        resident(wh), resident(bh),
        resident(w_out), resident(b_out),
    ]
    out_specs = pl.BlockSpec((TR, P * out_dim), lambda i: (i, 0))

    # VMEM budget: resident weights + double-buffered I/O tiles + in-kernel
    # intermediates (acc/act/y/std/col etc.), capped for v7x's 64 MiB VMEM.
    def nbytes(a):
        return a.size * a.dtype.itemsize
    weight_bytes = sum(nbytes(a) for a in (w0h, w0e, b0, wh, bh, w_out, b_out))
    in_tile_bytes = TR * P * (h_dim * h_state.dtype.itemsize
                              + feat_dim * encoded_obs.dtype.itemsize)
    out_tile_bytes = TR * P * out_dim * 4
    interm_bytes = 8 * TR * P * max(h_dim, out_dim) * 4
    vmem_limit = int(min(32 << 20,
                         max(8 << 20,
                             weight_bytes + 2 * (in_tile_bytes + out_tile_bytes)
                             + interm_bytes + (2 << 20))))

    out = pl.pallas_call(
        functools.partial(_repr_model_kernel, n_hidden=n_hidden,
                          z_dim=z_dim, out_dim=out_dim, min_std=min_std),
        grid=(n_tiles,),
        in_specs=in_specs,
        out_specs=out_specs,
        out_shape=jax.ShapeDtypeStruct((R_p, P * out_dim), jnp.float32),
        compiler_params=pltpu.CompilerParams(
            dimension_semantics=("parallel",),
            vmem_limit_bytes=vmem_limit),
    )(h_packed, e_packed, w0h, w0e, b0, wh, bh, w_out, b_out)

    y = out.reshape(Bp, out_dim)[:B]      # free view back to per-row layout
    mu = y[:, :z_dim]
    std = y[:, z_dim:]
    # TODO(synk): torch Independent(Normal(mu, std), 1) distribution object has
    # no Pallas equivalent; the kernel returns its parameters (mu, std).
    return mu, std


# ----------------------------------------------------------------------------
# Parameter construction (shapes per FeedForwardNet.__init__).
# Kernel weights are P-fold block-diagonal bf16; a plain f32 copy is returned
# for the pure-JAX reference.
# ----------------------------------------------------------------------------
def make_weights(key, h_dim, feat_dim, z_dim, n_ff_layers, pack):
    in_dim = h_dim + feat_dim
    out_dim = 2 * z_dim
    # keep packed lane widths modest if features are already wide
    pack = max(1, min(pack, max(1, 256 // max(h_dim, feat_dim, out_dim))))

    ks = jax.random.split(key, 6)
    scale = 0.1
    w0 = scale * jax.random.normal(ks[0], (in_dim, h_dim), jnp.float32)
    b0 = scale * jax.random.normal(ks[1], (1, h_dim), jnp.float32)
    n_hidden = n_ff_layers - 1
    nh = max(n_hidden, 1)  # keep a non-empty (unused) stack if n_ff_layers == 1
    wh = scale * jax.random.normal(ks[2], (nh, h_dim, h_dim), jnp.float32)
    bh = scale * jax.random.normal(ks[3], (nh, 1, h_dim), jnp.float32)
    if n_hidden == 0:
        wh = jnp.zeros_like(wh)
        bh = jnp.zeros_like(bh)
    w_out = scale * jax.random.normal(ks[4], (h_dim, out_dim), jnp.float32)
    b_out = scale * jax.random.normal(ks[5], (1, out_dim), jnp.float32)

    ref = dict(w0=w0, b0=b0, wh=wh, bh=bh, w_out=w_out, b_out=b_out,
               n_hidden=n_hidden)

    eye = jnp.eye(pack, dtype=jnp.float32)
    bd = lambda w: jnp.kron(eye, w)       # pack copies of w on the diagonal
    packed = dict(
        w0h=bd(w0[:h_dim]).astype(jnp.bfloat16),    # rows hit by h_state
        w0e=bd(w0[h_dim:]).astype(jnp.bfloat16),    # rows hit by encoded_obs
        b0=jnp.tile(b0, (1, pack)),
        wh=jnp.stack([bd(wh[l]) for l in range(nh)]).astype(jnp.bfloat16),
        bh=jnp.tile(bh, (1, 1, pack)),
        w_out=bd(w_out).astype(jnp.bfloat16),
        b_out=jnp.tile(b_out, (1, pack)),
        n_hidden=n_hidden, pack=pack,
        h_dim=h_dim, feat_dim=feat_dim, z_dim=z_dim,
    )
    return packed, ref


# ----------------------------------------------------------------------------
# Pure-JAX reference (original module semantics: concat -> MLP -> chunk)
# ----------------------------------------------------------------------------
def repr_model_ref(h_state, encoded_obs, ref_weights, *, min_std):
    w0, b0 = ref_weights["w0"], ref_weights["b0"]
    wh, bh = ref_weights["wh"], ref_weights["bh"]
    w_out, b_out = ref_weights["w_out"], ref_weights["b_out"]
    n_hidden = ref_weights["n_hidden"]

    x = jnp.concatenate([h_state, encoded_obs], axis=1)
    act = jnp.maximum(x @ w0 + b0, 0.0)
    for l in range(n_hidden):
        act = jnp.maximum(act @ wh[l] + bh[l], 0.0)
    y = act @ w_out + b_out
    z_dim = y.shape[1] // 2
    mu, pre_std = y[:, :z_dim], y[:, z_dim:]
    std = jax.nn.softplus(pre_std + 0.55) + min_std
    return mu, std


if __name__ == "__main__":
    params = dict(h_dim=32, feat_dim=32, z_dim=16, n_ff_layers=3, min_std=0.1)
    B = 8

    key = jax.random.PRNGKey(0)
    k_h, k_e, k_w = jax.random.split(key, 3)
    h_state = jax.random.normal(k_h, (B, params["h_dim"]), jnp.float32)
    encoded_obs = jax.random.normal(k_e, (B, params["feat_dim"]), jnp.float32)

    pack = _default_pack()
    weights, ref_weights = make_weights(k_w, params["h_dim"], params["feat_dim"],
                                        params["z_dim"], params["n_ff_layers"],
                                        pack)

    mu, std = repr_model_forward(h_state, encoded_obs, weights,
                                 min_std=params["min_std"])
    jax.block_until_ready((mu, std))

    mu_ref, std_ref = repr_model_ref(h_state, encoded_obs, ref_weights,
                                     min_std=params["min_std"])
    # bf16 dot inputs (f32 accumulation) => relaxed tolerance vs f32 reference.
    assert jnp.allclose(mu, mu_ref, atol=2e-2, rtol=2e-2), \
        float(jnp.max(jnp.abs(mu - mu_ref)))
    assert jnp.allclose(std, std_ref, atol=2e-2, rtol=2e-2), \
        float(jnp.max(jnp.abs(std - std_ref)))

    print("KERNEL_OK")
</pallas_src>

<mosaic_0001>
module attributes {stable_mosaic.version = 11 : i64} {
  func.func @_repr_model_kernel(%arg0: i32, %arg1: memref<8x256xf32, #tpu.memory_space<vmem>>, %arg2: memref<8x256xf32, #tpu.memory_space<vmem>>, %arg3: memref<256x256xbf16, #tpu.memory_space<vmem>>, %arg4: memref<256x256xbf16, #tpu.memory_space<vmem>>, %arg5: memref<1x256xf32, #tpu.memory_space<vmem>>, %arg6: memref<2x256x256xbf16, #tpu.memory_space<vmem>>, %arg7: memref<2x1x256xf32, #tpu.memory_space<vmem>>, %arg8: memref<256x256xbf16, #tpu.memory_space<vmem>>, %arg9: memref<1x256xf32, #tpu.memory_space<vmem>>, %arg10: memref<8x256xf32, #tpu.memory_space<vmem>>) attributes {dimension_semantics = [#tpu.dimension_semantics<parallel>], iteration_bounds = array<i64: 1>, scalar_prefetch = 0 : i64, scratch_operands = 0 : i64, tpu.core_type = #tpu.core_type<tc>, window_params = [{transform_indices = @transform_0, window_bounds = array<i64: 8, 256>}, {transform_indices = @transform_1, window_bounds = array<i64: 8, 256>}, {pipeline_mode = #tpu.pipeline_mode<synchronous>, transform_indices = @transform_2, window_bounds = array<i64: 256, 256>}, {pipeline_mode = #tpu.pipeline_mode<synchronous>, transform_indices = @transform_3, window_bounds = array<i64: 256, 256>}, {pipeline_mode = #tpu.pipeline_mode<synchronous>, transform_indices = @transform_4, window_bounds = array<i64: 1, 256>}, {pipeline_mode = #tpu.pipeline_mode<synchronous>, transform_indices = @transform_5, window_bounds = array<i64: 2, 256, 256>}, {pipeline_mode = #tpu.pipeline_mode<synchronous>, transform_indices = @transform_6, window_bounds = array<i64: 2, 1, 256>}, {pipeline_mode = #tpu.pipeline_mode<synchronous>, transform_indices = @transform_7, window_bounds = array<i64: 256, 256>}, {pipeline_mode = #tpu.pipeline_mode<synchronous>, transform_indices = @transform_8, window_bounds = array<i64: 1, 256>}, {transform_indices = @transform_9, window_bounds = array<i64: 8, 256>}]} {
    %c0 = arith.constant 0 : index
    %c0_0 = arith.constant 0 : index
    %0 = vector.load %arg1[%c0, %c0_0] : memref<8x256xf32, #tpu.memory_space<vmem>>, vector<8x256xf32>
    %1 = arith.truncf %0 : vector<8x256xf32> to vector<8x256xbf16>
    %c0_1 = arith.constant 0 : index
    %c0_2 = arith.constant 0 : index
    %2 = vector.load %arg3[%c0_1, %c0_2] : memref<256x256xbf16, #tpu.memory_space<vmem>>, vector<256x256xbf16>
    %cst = arith.constant dense<0.000000e+00> : vector<8x256xf32>
    %3 = tpu.matmul %1, %2, %cst {dimension_numbers = #tpu.dot_dimension_numbers<[1], [0], [0], [1], [0, 0, 1, 1], [], []>} : vector<8x256xbf16>, vector<256x256xbf16>, vector<8x256xf32> -> vector<8x256xf32>
    %c0_3 = arith.constant 0 : index
    %c0_4 = arith.constant 0 : index
    %4 = vector.load %arg2[%c0_3, %c0_4] : memref<8x256xf32, #tpu.memory_space<vmem>>, vector<8x256xf32>
    %5 = arith.truncf %4 : vector<8x256xf32> to vector<8x256xbf16>
    %c0_5 = arith.constant 0 : index
    %c0_6 = arith.constant 0 : index
    %6 = vector.load %arg4[%c0_5, %c0_6] : memref<256x256xbf16, #tpu.memory_space<vmem>>, vector<256x256xbf16>
    %cst_7 = arith.constant dense<0.000000e+00> : vector<8x256xf32>
    %7 = tpu.matmul %5, %6, %cst_7 {dimension_numbers = #tpu.dot_dimension_numbers<[1], [0], [0], [1], [0, 0, 1, 1], [], []>} : vector<8x256xbf16>, vector<256x256xbf16>, vector<8x256xf32> -> vector<8x256xf32>
    %8 = arith.addf %3, %7 : vector<8x256xf32>
    %c0_8 = arith.constant 0 : index
    %c0_9 = arith.constant 0 : index
    %9 = vector.load %arg5[%c0_8, %c0_9] : memref<1x256xf32, #tpu.memory_space<vmem>>, vector<1x256xf32>
    %10 = vector.broadcast %9 : vector<1x256xf32> to vector<8x256xf32>
    %11 = arith.addf %8, %10 : vector<8x256xf32>
    %cst_10 = arith.constant 0.000000e+00 : f32
    %12 = vector.broadcast %cst_10 : f32 to vector<8x256xf32>
    %13 = arith.maximumf %11, %12 : vector<8x256xf32>
    %14 = arith.truncf %13 : vector<8x256xf32> to vector<8x256xbf16>
    %c0_11 = arith.constant 0 : index
    %c0_12 = arith.constant 0 : index
    %c0_13 = arith.constant 0 : index
    %15 = vector.load %arg6[%c0_11, %c0_12, %c0_13] : memref<2x256x256xbf16, #tpu.memory_space<vmem>>, vector<1x256x256xbf16>
    %16 = vector.shape_cast %15 : vector<1x256x256xbf16> to vector<256x256xbf16>
    %cst_14 = arith.constant dense<0.000000e+00> : vector<8x256xf32>
    %17 = tpu.matmul %14, %16, %cst_14 {dimension_numbers = #tpu.dot_dimension_numbers<[1], [0], [0], [1], [0, 0, 1, 1], [], []>} : vector<8x256xbf16>, vector<256x256xbf16>, vector<8x256xf32> -> vector<8x256xf32>
    %c0_15 = arith.constant 0 : index
    %c0_16 = arith.constant 0 : index
    %c0_17 = arith.constant 0 : index
    %18 = vector.load %arg7[%c0_15, %c0_16, %c0_17] : memref<2x1x256xf32, #tpu.memory_space<vmem>>, vector<1x1x256xf32>
    %19 = vector.shape_cast %18 : vector<1x1x256xf32> to vector<1x256xf32>
    %20 = vector.broadcast %19 : vector<1x256xf32> to vector<8x256xf32>
    %21 = arith.addf %17, %20 : vector<8x256xf32>
    %cst_18 = arith.constant 0.000000e+00 : f32
    %22 = vector.broadcast %cst_18 : f32 to vector<8x256xf32>
    %23 = arith.maximumf %21, %22 : vector<8x256xf32>
    %24 = arith.truncf %23 : vector<8x256xf32> to vector<8x256xbf16>
    %c1 = arith.constant 1 : index
    %c0_19 = arith.constant 0 : index
    %c0_20 = arith.constant 0 : index
    %25 = vector.load %arg6[%c1, %c0_19, %c0_20] : memref<2x256x256xbf16, #tpu.memory_space<vmem>>, vector<1x256x256xbf16>
    %26 = vector.shape_cast %25 : vector<1x256x256xbf16> to vector<256x256xbf16>
    %cst_21 = arith.constant dense<0.000000e+00> : vector<8x256xf32>
    %27 = tpu.matmul %24, %26, %cst_21 {dimension_numbers = #tpu.dot_dimension_numbers<[1], [0], [0], [1], [0, 0, 1, 1], [], []>} : vector<8x256xbf16>, vector<256x256xbf16>, vector<8x256xf32> -> vector<8x256xf32>
    %c1_22 = arith.constant 1 : index
    %c0_23 = arith.constant 0 : index
    %c0_24 = arith.constant 0 : index
    %28 = vector.load %arg7[%c1_22, %c0_23, %c0_24] : memref<2x1x256xf32, #tpu.memory_space<vmem>>, vector<1x1x256xf32>
    %29 = vector.shape_cast %28 : vector<1x1x256xf32> to vector<1x256xf32>
    %30 = vector.broadcast %29 : vector<1x256xf32> to vector<8x256xf32>
    %31 = arith.addf %27, %30 : vector<8x256xf32>
    %cst_25 = arith.constant 0.000000e+00 : f32
    %32 = vector.broadcast %cst_25 : f32 to vector<8x256xf32>
    %33 = arith.maximumf %31, %32 : vector<8x256xf32>
    %34 = arith.truncf %33 : vector<8x256xf32> to vector<8x256xbf16>
    %c0_26 = arith.constant 0 : index
    %c0_27 = arith.constant 0 : index
    %35 = vector.load %arg8[%c0_26, %c0_27] : memref<256x256xbf16, #tpu.memory_space<vmem>>, vector<256x256xbf16>
    %cst_28 = arith.constant dense<0.000000e+00> : vector<8x256xf32>
    %36 = tpu.matmul %34, %35, %cst_28 {dimension_numbers = #tpu.dot_dimension_numbers<[1], [0], [0], [1], [0, 0, 1, 1], [], []>} : vector<8x256xbf16>, vector<256x256xbf16>, vector<8x256xf32> -> vector<8x256xf32>
    %c0_29 = arith.constant 0 : index
    %c0_30 = arith.constant 0 : index
    %37 = vector.load %arg9[%c0_29, %c0_30] : memref<1x256xf32, #tpu.memory_space<vmem>>, vector<1x256xf32>
    %38 = vector.broadcast %37 : vector<1x256xf32> to vector<8x256xf32>
    %39 = arith.addf %36, %38 : vector<8x256xf32>
    %40 = tpu.iota {dimensions = array<i32: 1>} : vector<8x256xi32>
    %c31_i32 = arith.constant 31 : i32
    %41 = vector.broadcast %c31_i32 : i32 to vector<8x256xi32>
    %42 = arith.andi %40, %41 : vector<8x256xi32>
    %cst_31 = arith.constant 5.500000e-01 : f32
    %43 = vector.broadcast %cst_31 : f32 to vector<8x256xf32>
    %44 = arith.addf %39, %43 : vector<8x256xf32>
    %cst_32 = arith.constant 0.000000e+00 : f32
    %45 = vector.broadcast %cst_32 : f32 to vector<8x256xf32>
    %46 = arith.maximumf %44, %45 : vector<8x256xf32>
    %47 = vector.broadcast %cst_32 : f32 to vector<8x256xf32>
    %48 = arith.subf %44, %47 : vector<8x256xf32>
    %49 = arith.cmpf one, %48, %48 : vector<8x256xf32>
    %50 = vector.broadcast %cst_32 : f32 to vector<8x256xf32>
    %51 = arith.addf %44, %50 : vector<8x256xf32>
    %52 = math.absf %48 : vector<8x256xf32>
    %cst_33 = arith.constant 0.000000e+00 : f32
    %53 = vector.broadcast %cst_33 : f32 to vector<8x256xf32>
    %54 = arith.subf %53, %52 : vector<8x256xf32>
    %55 = math.exp %54 : vector<8x256xf32>
    %56 = math.log1p %55 : vector<8x256xf32>
    %57 = arith.addf %46, %56 : vector<8x256xf32>
    %58 = arith.select %49, %51, %57 : vector<8x256xi1>, vector<8x256xf32>
    %cst_34 = arith.constant 1.000000e-01 : f32
    %59 = vector.broadcast %cst_34 : f32 to vector<8x256xf32>
    %60 = arith.addf %58, %59 : vector<8x256xf32>
    %c16_i32 = arith.constant 16 : i32
    %61 = vector.broadcast %c16_i32 : i32 to vector<8x256xi32>
    %62 = arith.cmpi slt, %42, %61 : vector<8x256xi32>
    %63 = arith.select %62, %39, %60 : vector<8x256xi1>, vector<8x256xf32>
    %c0_35 = arith.constant 0 : index
    %c0_36 = arith.constant 0 : index
    %64 = vector.load %arg10[%c0_35, %c0_36] : memref<8x256xf32, #tpu.memory_space<vmem>>, vector<8x256xf32>
    tpu.vector_store %arg10[%c0_35, %c0_36], %63 {strides = array<i32>} : memref<8x256xf32, #tpu.memory_space<vmem>>, vector<8x256xf32>,
    return
  }
  func.func @transform_0(%arg0: i32) -> (i32, i32) {
    %c0_i32 = arith.constant 0 : i32
    %c0_i32_0 = arith.constant 0 : i32
    return %arg0, %c0_i32 : i32, i32
  }
  func.func @transform_1(%arg0: i32) -> (i32, i32) {
    %c0_i32 = arith.constant 0 : i32
    %c0_i32_0 = arith.constant 0 : i32
    return %arg0, %c0_i32 : i32, i32
  }
  func.func @transform_2(%arg0: i32) -> (i32, i32) {
    %c0_i32 = arith.constant 0 : i32
    %c0_i32_0 = arith.constant 0 : i32
    %c0_i32_1 = arith.constant 0 : i32
    return %c0_i32, %c0_i32_0 : i32, i32
  }
  func.func @transform_3(%arg0: i32) -> (i32, i32) {
    %c0_i32 = arith.constant 0 : i32
    %c0_i32_0 = arith.constant 0 : i32
    %c0_i32_1 = arith.constant 0 : i32
    return %c0_i32, %c0_i32_0 : i32, i32
  }
  func.func @transform_4(%arg0: i32) -> (i32, i32) {
    %c0_i32 = arith.constant 0 : i32
    %c0_i32_0 = arith.constant 0 : i32
    %c0_i32_1 = arith.constant 0 : i32
    return %c0_i32, %c0_i32_0 : i32, i32
  }
  func.func @transform_5(%arg0: i32) -> (i32, i32, i32) {
    %c0_i32 = arith.constant 0 : i32
    %c0_i32_0 = arith.constant 0 : i32
    %c0_i32_1 = arith.constant 0 : i32
    %c0_i32_2 = arith.constant 0 : i32
    return %c0_i32, %c0_i32_0, %c0_i32_1 : i32, i32, i32
  }
  func.func @transform_6(%arg0: i32) -> (i32, i32, i32) {
    %c0_i32 = arith.constant 0 : i32
    %c0_i32_0 = arith.constant 0 : i32
    %c0_i32_1 = arith.constant 0 : i32
    %c0_i32_2 = arith.constant 0 : i32
    return %c0_i32, %c0_i32_0, %c0_i32_1 : i32, i32, i32
  }
  func.func @transform_7(%arg0: i32) -> (i32, i32) {
    %c0_i32 = arith.constant 0 : i32
    %c0_i32_0 = arith.constant 0 : i32
    %c0_i32_1 = arith.constant 0 : i32
    return %c0_i32, %c0_i32_0 : i32, i32
  }
  func.func @transform_8(%arg0: i32) -> (i32, i32) {
    %c0_i32 = arith.constant 0 : i32
    %c0_i32_0 = arith.constant 0 : i32
    %c0_i32_1 = arith.constant 0 : i32
    return %c0_i32, %c0_i32_0 : i32, i32
  }
  func.func @transform_9(%arg0: i32) -> (i32, i32) {
    %c0_i32 = arith.constant 0 : i32
    %c0_i32_0 = arith.constant 0 : i32
    return %arg0, %c0_i32 : i32, i32
  }
}

</mosaic_0001>

<bundles_post_ra>
// kernel: tpu_custom_call.1
= control target key start
LH: loop header
LB: loop body
LE: loop exit
PB: predicated region body
PF: predicated region fallthrough
CT: control target
= control target key end

     0   :  { %14 = vsyncpa [#allocation3], 0  ;;  %s2180_s0 = inlined_call_operand.hbm [shape: f32[8,256], index: 0, kind: input, shape index: {}]   ;;  %s2181_s1 = inlined_call_operand.hbm [shape: f32[8,256], index: 1, kind: input, shape index: {}]   ;;  %s2182_s2 = inlined_call_operand.hbm [shape: bf16[256,256], index: 2, kind: input, shape index: {}]   ;;  %s2183_s3 = inlined_call_operand.hbm [shape: bf16[256,256], index: 3, kind: input, shape index: {}]   ;;  %s2184_s4 = inlined_call_operand.vmem [shape: f32[1,256], index: 4, kind: input, shape index: {}]   ;;  %s2185_s5 = inlined_call_operand.hbm [shape: bf16[2,256,256], index: 5, kind: input, shape index: {}]   ;;  %s2186_s6 = inlined_call_operand.vmem [shape: f32[2,1,256], index: 6, kind: input, shape index: {}]   ;;  %s2187_s7 = inlined_call_operand.hbm [shape: bf16[256,256], index: 7, kind: input, shape index: {}]   ;;  %s2188_s8 = inlined_call_operand.vmem [shape: f32[1,256], index: 8, kind: input, shape index: {}]   ;;  %s2189_s9 = inlined_call_operand.hbm [shape: f32[8,256], index: 9, kind: output, shape index: {}]  }
   0x1   :  { %15 = vsyncpa [#allocation6], 0 }
   0x2   :  { %16 = vsyncpa [#allocation9], 0 }
   0x3   :  { %17 = vsyncpa [#allocation12], 0 }
   0x4   :  { %18 = vsyncpa [#allocation4], 0  ;;  %s1999_s30 = smov [#allocation5]   ;;  %s1835_s13 = scalar_lea.hbm %s2181_s1, 256 }
   0x5   :  { %s35_s10 = sshll.u32 %s1999_s30, 4  ;;  %p1836_p0 = scmp.ne.s32.totalorder %s2181_s1, %s1835_s13  ;;  %s36_s10 = int_to_ptr.vmem [resolvable:$true] %s35_s10 }
   0x6   :  { %p1839_p1 = scmp.lt.u32.totalorder %s1835_s13, %s2181_s1 }
   0x8   :  { %p1841_p2 = pnand %p1839_p1, %p1836_p0 }
   0xa   :  { %1844 = shalt.err (!%p1841_p2)
}
   0xb   :  { %s1845_s18 = scalar_lea.vmem %s36_s10, 256  ;;  %p1850_p4 = scmp.lt.s32.totalorder %s36_s10, %s36_s10 }
   0xc   :  { %p1846_p3 = scmp.ne.s32.totalorder %s36_s10, %s1845_s18  ;;  %p1851_p5 = scmp.lt.s32.totalorder %s1845_s18, %s1845_s18 }
   0xe   :  { %p1852_p6 = por %p1851_p5, %p1850_p4 }
  0x10   :  { %p1853_p7 = pnand %p1852_p6, %p1846_p3 }
  0x12   :  { %1856 = shalt.err (!%p1853_p7)
}
  0x13   :  { %38 = dma.hbm_to_vmem [thread:$0]  %s2181_s1, 256, %s36_s10, [#allocation6]  }
  0x14   :  { %s2000_s21 = smov [#allocation8]   ;;  %s2001_s23 = smov [#allocation2]  }
  0x15   :  { %s56_s22 = sshll.u32 %s2000_s21, 4  ;;  %s25_s24 = sshll.u32 %s2001_s23, 4  ;;  %s57_s22 = int_to_ptr.vmem [resolvable:$true] %s56_s22  ;;  %s26_s24 = int_to_ptr.vmem [resolvable:$true] %s25_s24 }
  0x16   :  { %s1857_s27 = scalar_lea.hbm %s2183_s3, 4096 }
  0x17   :  { %p1858_p8 = scmp.ne.s32.totalorder %s2183_s3, %s1857_s27  ;;  %p1861_p9 = scmp.lt.u32.totalorder %s1857_s27, %s2183_s3 }
  0x19   :  { %p1863_p10 = pnand %p1861_p9, %p1858_p8 }
  0x1b   :  { %1866 = shalt.err (!%p1863_p10)
}
  0x1c   :  { %s1867_s1 = scalar_lea.vmem %s57_s22, 4096  ;;  %p1872_p12 = scmp.lt.s32.totalorder %s57_s22, %s57_s22 }
  0x1d   :  { %p1868_p11 = scmp.ne.s32.totalorder %s57_s22, %s1867_s1  ;;  %p1873_p13 = scmp.lt.s32.totalorder %s1867_s1, %s1867_s1 }
  0x1f   :  { %p1874_p0 = por %p1873_p13, %p1872_p12 }
  0x21   :  { %p1875_p1 = pnand %p1874_p0, %p1868_p11 }
  0x23   :  { %1878 = shalt.err (!%p1875_p1)
}
  0x24   :  { %s2002_s10 = smov 128   ;;  %s2003_s12 = smov 8  }
  0x25   :  { %62 = dma.hbm_to_vmem [thread:$0]  %s2183_s3, 4096, %s57_s22, [#allocation9], %s2002_s10, %s2002_s10, %s2003_s12  }
  0x26   :  { %s1879_s17 = scalar_lea.hbm %s2180_s0, 256 }
  0x27   :  { %p1880_p2 = scmp.ne.s32.totalorder %s2180_s0, %s1879_s17  ;;  %p1883_p3 = scmp.lt.u32.totalorder %s1879_s17, %s2180_s0 }
  0x29   :  { %p1885_p4 = pnand %p1883_p3, %p1880_p2 }
  0x2b   :  { %1888 = shalt.err (!%p1885_p4)
}
  0x2c   :  { %s1889_s23 = scalar_lea.vmem %s26_s24, 256  ;;  %p1894_p6 = scmp.lt.s32.totalorder %s26_s24, %s26_s24 }
  0x2d   :  { %p1890_p5 = scmp.ne.s32.totalorder %s26_s24, %s1889_s23  ;;  %p1895_p7 = scmp.lt.s32.totalorder %s1889_s23, %s1889_s23 }
  0x2f   :  { %p1896_p8 = por %p1895_p7, %p1894_p6 }
  0x31   :  { %p1897_p9 = pnand %p1896_p8, %p1890_p5 }
  0x33   :  { %1900 = shalt.err (!%p1897_p9)
}
  0x34   :  { %28 = dma.hbm_to_vmem [thread:$0]  %s2180_s0, 256, %s26_s24, [#allocation3]  }
  0x35   :  { %s2004_s25 = smov [#allocation7]   ;;  %s2005_s27 = smov [#allocation10]  }
  0x36   :  { %s44_s26 = sshll.u32 %s2004_s25, 4  ;;  %s70_s28 = sshll.u32 %s2005_s27, 4  ;;  %s45_s26 = int_to_ptr.vmem [resolvable:$true] %s44_s26  ;;  %s71_s28 = int_to_ptr.vmem [resolvable:$true] %s70_s28 }
  0x37   :  { %s1901_s11 = scalar_lea.hbm %s2182_s2, 4096 }
  0x38   :  { %p1902_p10 = scmp.ne.s32.totalorder %s2182_s2, %s1901_s11  ;;  %p1905_p11 = scmp.lt.u32.totalorder %s1901_s11, %s2182_s2 }
  0x3a   :  { %p1907_p12 = pnand %p1905_p11, %p1902_p10 }
  0x3c   :  { %1910 = shalt.err (!%p1907_p12)
}
  0x3d   :  { %s1911_s0 = scalar_lea.vmem %s45_s26, 4096  ;;  %p1916_p0 = scmp.lt.s32.totalorder %s45_s26, %s45_s26 }
  0x3e   :  { %p1912_p13 = scmp.ne.s32.totalorder %s45_s26, %s1911_s0  ;;  %p1917_p1 = scmp.lt.s32.totalorder %s1911_s0, %s1911_s0 }
  0x40   :  { %p1918_p2 = por %p1917_p1, %p1916_p0 }
  0x42   :  { %p1919_p3 = pnand %p1918_p2, %p1912_p13 }
  0x44   :  { %1922 = shalt.err (!%p1919_p3)
}
  0x45   :  { %50 = dma.hbm_to_vmem [thread:$0]  %s2182_s2, 4096, %s45_s26, [#allocation6], %s2002_s10, %s2002_s10, %s2003_s12  }
  0x46   :  { %s1923_s19 = scalar_lea.hbm %s2185_s5, 8192 }
  0x47   :  { %p1924_p4 = scmp.ne.s32.totalorder %s2185_s5, %s1923_s19  ;;  %p1927_p5 = scmp.lt.u32.totalorder %s1923_s19, %s2185_s5 }
  0x49   :  { %p1929_p6 = pnand %p1927_p5, %p1924_p4 }
  0x4b   :  { %1932 = shalt.err (!%p1929_p6)
}
  0x4c   :  { %s1933_s22 = scalar_lea.vmem %s71_s28, 8192  ;;  %p1938_p8 = scmp.lt.s32.totalorder %s71_s28, %s71_s28 }
  0x4d   :  { %p1934_p7 = scmp.ne.s32.totalorder %s71_s28, %s1933_s22  ;;  %p1939_p9 = scmp.lt.s32.totalorder %s1933_s22, %s1933_s22 }
  0x4f   :  { %p1940_p10 = por %p1939_p9, %p1938_p8 }
  0x51   :  { %p1941_p11 = pnand %p1940_p10, %p1934_p7 }
  0x53   :  { %1944 = shalt.err (!%p1941_p11)
}
  0x54   :  { %76 = dma.hbm_to_vmem [thread:$0]  %s2185_s5, 8192, %s71_s28, [#allocation9], %s2002_s10, %s2002_s10, %s2003_s12  }
  0x55   :  { %s2006_s26 = smov [#allocation11]   ;;  %s1945_s11 = scalar_lea.hbm %s2187_s7, 4096 }
  0x56   :  { %s84_s27 = sshll.u32 %s2006_s26, 4  ;;  %p1946_p12 = scmp.ne.s32.totalorder %s2187_s7, %s1945_s11  ;;  %s85_s27 = int_to_ptr.vmem [resolvable:$true] %s84_s27 }
  0x57   :  { %p1949_p13 = scmp.lt.u32.totalorder %s1945_s11, %s2187_s7 }
  0x59   :  { %p1951_p0 = pnand %p1949_p13, %p1946_p12 }
  0x5b   :  { %1954 = shalt.err (!%p1951_p0)
}
  0x5c   :  { %s1955_s0 = scalar_lea.vmem %s85_s27, 4096  ;;  %p1960_p2 = scmp.lt.s32.totalorder %s85_s27, %s85_s27 }
  0x5d   :  { %p1956_p1 = scmp.ne.s32.totalorder %s85_s27, %s1955_s0  ;;  %p1961_p3 = scmp.lt.s32.totalorder %s1955_s0, %s1955_s0 }
  0x5f   :  { %p1962_p4 = por %p1961_p3, %p1960_p2 }
  0x61   :  { %p1963_p5 = pnand %p1962_p4, %p1956_p1 }
  0x63   :  { %1966 = shalt.err (!%p1963_p5)
}
  0x64   :  { %90 = dma.hbm_to_vmem [thread:$0]  %s2187_s7, 4096, %s85_s27, [#allocation12], %s2002_s10, %s2002_s10, %s2003_s12  }
  0x65   :  { %1989 = dma.done.wait [#allocation3], 256  }
  0x66   :  { %1990 = vsyncadd [#allocation3], 4294967040 }
  0x67   :  { %1991 = dma.done.wait [#allocation6], 4352  }
  0x68   :  { %1992 = vsyncadd [#allocation6], 4294962944 }
  0x69   :  { %1993 = dma.done.wait [#allocation9], 12288  }
  0x6a   :  { %1994 = vsyncadd [#allocation9], 4294955008 }
  0x6b   :  { %1995 = dma.done.wait [#allocation12], 4096  }
  0x6c   :  { %1996 = vsyncadd [#allocation12], 4294963200  ;;  %v1587_v0 = vld [vmem:[#allocation8 + $0x4] ss:$8 sps:$4 sm:$0xff]   ;;  %v1591_v2 = vld [vmem:[#allocation8] ss:$8 sps:$4 sm:$0xff]  }
  0x6d   :  { %v1589_v1 = vld [vmem:[#allocation7 + $0x4] ss:$8 sps:$4 sm:$0xff]   ;;  %343 = vmatprep.subr.bf16.mxu0 %v1587_v0  ;;  %v1592_v3 = vld [vmem:[#allocation7] ss:$8 sps:$4 sm:$0xff]   ;;  %v1593_v4 = vld [vmem:[#allocation8 + $0x14] ss:$8 sps:$4 sm:$0xff]  }
  0x6e   :  { %544 = vmatprep.subr.bf16.mxu1 %v1589_v1  ;;  %344 = vmatpush1.bf16.msra.mxu0 %v1591_v2  ;;  %v1595_v5 = vld [vmem:[#allocation7 + $0x14] ss:$8 sps:$4 sm:$0xff]   ;;  %v1597_v6 = vld [vmem:[#allocation8 + $0x10] ss:$8 sps:$4 sm:$0xff]   ;;  %v1599_v8 = vld [vmem:[#allocation8 + $0x24] ss:$8 sps:$4 sm:$0xff]  }
  0x6f   :  { %545 = vmatpush1.bf16.msra.mxu1 %v1592_v3  ;;  %345 = vmatprep.subr.bf16.mxu0 %v1593_v4  ;;  %v1598_v7 = vld [vmem:[#allocation7 + $0x10] ss:$8 sps:$4 sm:$0xff]   ;;  %v1601_v9 = vld [vmem:[#allocation7 + $0x24] ss:$8 sps:$4 sm:$0xff]   ;;  %v1603_v10 = vld [vmem:[#allocation8 + $0x20] ss:$8 sps:$4 sm:$0xff]  }
  0x70   :  { %546 = vmatprep.subr.bf16.mxu1 %v1595_v5  ;;  %v1604_v11 = vld [vmem:[#allocation7 + $0x20] ss:$8 sps:$4 sm:$0xff]   ;;  %v1605_v12 = vld [vmem:[#allocation8 + $0x34] ss:$8 sps:$4 sm:$0xff]   ;;  %v1609_v14 = vld [vmem:[#allocation8 + $0x30] ss:$8 sps:$4 sm:$0xff]  }
  0x71   :  { %v1607_v13 = vld [vmem:[#allocation7 + $0x34] ss:$8 sps:$4 sm:$0xff]   ;;  %v1610_v15 = vld [vmem:[#allocation7 + $0x30] ss:$8 sps:$4 sm:$0xff]   ;;  %v1611_v16 = vld [vmem:[#allocation8 + $0x44] ss:$8 sps:$4 sm:$0xff]  }
  0x72   :  { %346 = vmatpush1.bf16.msra.mxu0 %v1597_v6  ;;  %v1613_v17 = vld [vmem:[#allocation7 + $0x44] ss:$8 sps:$4 sm:$0xff]   ;;  %v1615_v18 = vld [vmem:[#allocation8 + $0x40] ss:$8 sps:$4 sm:$0xff]   ;;  %v1617_v20 = vld [vmem:[#allocation8 + $0x54] ss:$8 sps:$4 sm:$0xff]  }
  0x73   :  { %547 = vmatpush1.bf16.msra.mxu1 %v1598_v7  ;;  %347 = vmatprep.subr.bf16.mxu0 %v1599_v8  ;;  %v1616_v19 = vld [vmem:[#allocation7 + $0x40] ss:$8 sps:$4 sm:$0xff]   ;;  %v1619_v21 = vld [vmem:[#allocation7 + $0x54] ss:$8 sps:$4 sm:$0xff]   ;;  %v1621_v22 = vld [vmem:[#allocation8 + $0x50] ss:$8 sps:$4 sm:$0xff]  }
  0x74   :  { %548 = vmatprep.subr.bf16.mxu1 %v1601_v9  ;;  %v1622_v23 = vld [vmem:[#allocation7 + $0x50] ss:$8 sps:$4 sm:$0xff]   ;;  %v1623_v24 = vld [vmem:[#allocation8 + $0x64] ss:$8 sps:$4 sm:$0xff]   ;;  %v1627_v26 = vld [vmem:[#allocation8 + $0x60] ss:$8 sps:$4 sm:$0xff]  }
  0x75   :  { %v1625_v25 = vld [vmem:[#allocation7 + $0x64] ss:$8 sps:$4 sm:$0xff]   ;;  %v1628_v27 = vld [vmem:[#allocation7 + $0x60] ss:$8 sps:$4 sm:$0xff]   ;;  %v1629_v28 = vld [vmem:[#allocation8 + $0x74] ss:$8 sps:$4 sm:$0xff]  }
  0x76   :  { %348 = vmatpush1.bf16.msra.mxu0 %v1603_v10  ;;  %v1631_v29 = vld [vmem:[#allocation7 + $0x74] ss:$8 sps:$4 sm:$0xff]   ;;  %v1633_v30 = vld [vmem:[#allocation8 + $0x70] ss:$8 sps:$4 sm:$0xff]   ;;  %v1635_v32 = vld [vmem:[#allocation8 + $0x84] ss:$8 sps:$4 sm:$0xff]  }
  0x77   :  { %549 = vmatpush1.bf16.msra.mxu1 %v1604_v11  ;;  %349 = vmatprep.subr.bf16.mxu0 %v1605_v12  ;;  %v1634_v31 = vld [vmem:[#allocation7 + $0x70] ss:$8 sps:$4 sm:$0xff]   ;;  %v1637_v33 = vld [vmem:[#allocation7 + $0x84] ss:$8 sps:$4 sm:$0xff]   ;;  %v1639_v34 = vld [vmem:[#allocation8 + $0x80] ss:$8 sps:$4 sm:$0xff]  }
  0x78   :  { %550 = vmatprep.subr.bf16.mxu1 %v1607_v13  ;;  %v1640_v35 = vld [vmem:[#allocation7 + $0x80] ss:$8 sps:$4 sm:$0xff]   ;;  %v1641_v36 = vld [vmem:[#allocation8 + $0x94] ss:$8 sps:$4 sm:$0xff]   ;;  %v1645_v38 = vld [vmem:[#allocation8 + $0x90] ss:$8 sps:$4 sm:$0xff]  }
  0x79   :  { %v1643_v37 = vld [vmem:[#allocation7 + $0x94] ss:$8 sps:$4 sm:$0xff]   ;;  %v1646_v39 = vld [vmem:[#allocation7 + $0x90] ss:$8 sps:$4 sm:$0xff]   ;;  %v1647_v40 = vld [vmem:[#allocation8 + $0xa4] ss:$8 sps:$4 sm:$0xff]  }
  0x7a   :  { %350 = vmatpush1.bf16.msra.mxu0 %v1609_v14  ;;  %v1649_v41 = vld [vmem:[#allocation7 + $0xa4] ss:$8 sps:$4 sm:$0xff]   ;;  %v1651_v42 = vld [vmem:[#allocation8 + $0xa0] ss:$8 sps:$4 sm:$0xff]   ;;  %v1653_v44 = vld [vmem:[#allocation8 + $0xb4] ss:$8 sps:$4 sm:$0xff]  }
  0x7b   :  { %551 = vmatpush1.bf16.msra.mxu1 %v1610_v15  ;;  %351 = vmatprep.subr.bf16.mxu0 %v1611_v16  ;;  %v1652_v43 = vld [vmem:[#allocation7 + $0xa0] ss:$8 sps:$4 sm:$0xff]   ;;  %v1655_v45 = vld [vmem:[#allocation7 + $0xb4] ss:$8 sps:$4 sm:$0xff]   ;;  %v1657_v47 = vld [vmem:[#allocation8 + $0xb0] ss:$8 sps:$4 sm:$0xff]  }
  0x7c   :  { %552 = vmatprep.subr.bf16.mxu1 %v1613_v17  ;;  %v148_v46 = vld [vmem:[#allocation5 + $0x8] sm:$0xff]  ;;  %v112_v50 = vld [vmem:[#allocation2 + $0x8] sm:$0xff]  ;;  %v147_v4 = vld [vmem:[#allocation5] sm:$0xff] }
  0x7d   :  { %v1658_v48 = vld [vmem:[#allocation7 + $0xb0] ss:$8 sps:$4 sm:$0xff]   ;;  %v150_v49 = vpack.c.bf16 %v148_v46, %v148_v46  ;;  %v1659_v51 = vld [vmem:[#allocation8 + $0xc4] ss:$8 sps:$4 sm:$0xff]   ;;  %v114_v52 = vpack.c.bf16 %v112_v50, %v112_v50  ;;  %v1663_v54 = vld [vmem:[#allocation8 + $0xc0] ss:$8 sps:$4 sm:$0xff]   ;;  %v149_v8 = vpack.c.bf16 %v147_v4, %v147_v4  ;;  %v587_v4 = vlaneseq }
  0x7e   :  { %352 = vmatpush1.bf16.msra.mxu0 %v1615_v18  ;;  %v1661_v53 = vld [vmem:[#allocation7 + $0xc4] ss:$8 sps:$4 sm:$0xff]   ;;  %v1664_v55 = vld [vmem:[#allocation7 + $0xc0] ss:$8 sps:$4 sm:$0xff]   ;;  %v1665_v56 = vld [vmem:[#allocation8 + $0xd4] ss:$8 sps:$4 sm:$0xff]  }
  0x7f   :  { %553 = vmatpush1.bf16.msra.mxu1 %v1616_v19  ;;  %353 = vmatprep.subr.bf16.mxu0 %v1617_v20  ;;  %v1667_v57 = vld [vmem:[#allocation7 + $0xd4] ss:$8 sps:$4 sm:$0xff]   ;;  %v1669_v58 = vld [vmem:[#allocation8 + $0xd0] ss:$8 sps:$4 sm:$0xff]   ;;  %v1671_v60 = vld [vmem:[#allocation8 + $0xe4] ss:$8 sps:$4 sm:$0xff]  }
  0x80   :  { %554 = vmatprep.subr.bf16.mxu1 %v1619_v21  ;;  %375 = vmatprep.mubr.bf16.mxu0 %v150_v49  ;;  %v1670_v59 = vld [vmem:[#allocation7 + $0xd0] ss:$8 sps:$4 sm:$0xff]   ;;  %v1673_v61 = vld [vmem:[#allocation7 + $0xe4] ss:$8 sps:$4 sm:$0xff]   ;;  %v1675_v62 = vld [vmem:[#allocation8 + $0xe0] ss:$8 sps:$4 sm:$0xff]  }
  0x81   :  { %576 = vmatprep.mubr.bf16.mxu1 %v114_v52  ;;  %v1676_v63 = vld [vmem:[#allocation7 + $0xe0] ss:$8 sps:$4 sm:$0xff]   ;;  %v1677_v0 = vld [vmem:[#allocation8 + $0xf4] ss:$8 sps:$4 sm:$0xff]   ;;  %v1681_v2 = vld [vmem:[#allocation8 + $0xf0] ss:$8 sps:$4 sm:$0xff]  }
  0x82   :  { %354 = vmatpush1.bf16.msra.mxu0 %v1621_v22  ;;  %v1679_v1 = vld [vmem:[#allocation7 + $0xf4] ss:$8 sps:$4 sm:$0xff]   ;;  %v1682_v3 = vld [vmem:[#allocation7 + $0xf0] ss:$8 sps:$4 sm:$0xff]   ;;  %v111_v5 = vld [vmem:[#allocation2] sm:$0xff] }
  0x83   :  { %555 = vmatpush1.bf16.msra.mxu1 %v1622_v23  ;;  %355 = vmatprep.subr.bf16.mxu0 %v1623_v24  ;;  %v1685_v6 = vld [vmem:[#allocation10 + $0x4] ss:$8 sps:$4 sm:$0xff]   ;;  %v1683_v7 = vld [vmem:[#allocation10] ss:$8 sps:$4 sm:$0xff]   ;;  %v113_v9 = vpack.c.bf16 %v111_v5, %v111_v5  ;;  %v1688_v10 = vld [vmem:[#allocation10 + $0x14] ss:$8 sps:$4 sm:$0xff]  }
  0x84   :  { %556 = vmatprep.subr.bf16.mxu1 %v1625_v25  ;;  %v1686_v11 = vld [vmem:[#allocation10 + $0x10] ss:$8 sps:$4 sm:$0xff]   ;;  %v1691_v12 = vld [vmem:[#allocation10 + $0x24] ss:$8 sps:$4 sm:$0xff]   ;;  %v1689_v13 = vld [vmem:[#allocation10 + $0x20] ss:$8 sps:$4 sm:$0xff]  }
  0x85   :  { %v1694_v14 = vld [vmem:[#allocation10 + $0x34] ss:$8 sps:$4 sm:$0xff]   ;;  %v1692_v15 = vld [vmem:[#allocation10 + $0x30] ss:$8 sps:$4 sm:$0xff]   ;;  %v1697_v16 = vld [vmem:[#allocation10 + $0x44] ss:$8 sps:$4 sm:$0xff]  }
  0x86   :  { %356 = vmatpush1.bf16.msra.mxu0 %v1627_v26  ;;  %v1695_v17 = vld [vmem:[#allocation10 + $0x40] ss:$8 sps:$4 sm:$0xff]   ;;  %v1700_v18 = vld [vmem:[#allocation10 + $0x54] ss:$8 sps:$4 sm:$0xff]   ;;  %v1698_v19 = vld [vmem:[#allocation10 + $0x50] ss:$8 sps:$4 sm:$0xff]  }
  0x87   :  { %557 = vmatpush1.bf16.msra.mxu1 %v1628_v27  ;;  %357 = vmatprep.subr.bf16.mxu0 %v1629_v28  ;;  %v1703_v20 = vld [vmem:[#allocation10 + $0x64] ss:$8 sps:$4 sm:$0xff]   ;;  %v1701_v21 = vld [vmem:[#allocation10 + $0x60] ss:$8 sps:$4 sm:$0xff]   ;;  %v1706_v22 = vld [vmem:[#allocation10 + $0x74] ss:$8 sps:$4 sm:$0xff]  }
  0x88   :  { %558 = vmatprep.subr.bf16.mxu1 %v1631_v29  ;;  %v1704_v23 = vld [vmem:[#allocation10 + $0x70] ss:$8 sps:$4 sm:$0xff]   ;;  %v1709_v24 = vld [vmem:[#allocation10 + $0x84] ss:$8 sps:$4 sm:$0xff]   ;;  %v1707_v25 = vld [vmem:[#allocation10 + $0x80] ss:$8 sps:$4 sm:$0xff]  }
  0x89   :  { %v1712_v26 = vld [vmem:[#allocation10 + $0x94] ss:$8 sps:$4 sm:$0xff]   ;;  %v1710_v27 = vld [vmem:[#allocation10 + $0x90] ss:$8 sps:$4 sm:$0xff]   ;;  %v1715_v28 = vld [vmem:[#allocation10 + $0xa4] ss:$8 sps:$4 sm:$0xff]  }
  0x8a   :  { %358 = vmatpush1.bf16.msra.mxu0 %v1633_v30  ;;  %v1713_v29 = vld [vmem:[#allocation10 + $0xa0] ss:$8 sps:$4 sm:$0xff]   ;;  %v1718_v30 = vld [vmem:[#allocation10 + $0xb4] ss:$8 sps:$4 sm:$0xff]   ;;  %v1751_v52 = vld [vmem:[#allocation10 + $0x164] ss:$8 sps:$4 sm:$0xff]  }
  0x8b   :  { %559 = vmatpush1.bf16.msra.mxu1 %v1634_v31  ;;  %359 = vmatprep.subr.bf16.mxu0 %v1635_v32  ;;  %v1716_v31 = vld [vmem:[#allocation10 + $0xb0] ss:$8 sps:$4 sm:$0xff]   ;;  %v1721_v32 = vld [vmem:[#allocation10 + $0xc4] ss:$8 sps:$4 sm:$0xff]   ;;  %v1742_v46 = vld [vmem:[#allocation10 + $0x134] ss:$8 sps:$4 sm:$0xff]  }
  0x8c   :  { %560 = vmatprep.subr.bf16.mxu1 %v1637_v33  ;;  %v1719_v33 = vld [vmem:[#allocation10 + $0xc0] ss:$8 sps:$4 sm:$0xff]   ;;  %v1748_v50 = vld [vmem:[#allocation10 + $0x154] ss:$8 sps:$4 sm:$0xff]   ;;  %v588_v5 = vshrl.u32 %v587_v4, 7 }
  0x8d   :  { %v1743_v49 = vld [vmem:[#allocation10 + $0x140] ss:$8 sps:$4 sm:$0xff]  }
  0x8e   :  { %360 = vmatpush1.bf16.msra.mxu0 %v1639_v34  ;;  %v1724_v34 = vld [vmem:[#allocation10 + $0xd4] ss:$8 sps:$4 sm:$0xff]  }
  0x8f   :  { %561 = vmatpush1.bf16.msra.mxu1 %v1640_v35  ;;  %361 = vmatprep.subr.bf16.mxu0 %v1641_v36  ;;  %v1722_v35 = vld [vmem:[#allocation10 + $0xd0] ss:$8 sps:$4 sm:$0xff]   ;;  %v1727_v36 = vld [vmem:[#allocation10 + $0xe4] ss:$8 sps:$4 sm:$0xff]  }
  0x90   :  { %562 = vmatprep.subr.bf16.mxu1 %v1643_v37  ;;  %v1725_v37 = vld [vmem:[#allocation10 + $0xe0] ss:$8 sps:$4 sm:$0xff]  }
  0x92   :  { %362 = vmatpush1.bf16.msra.mxu0 %v1645_v38  ;;  %v1730_v38 = vld [vmem:[#allocation10 + $0xf4] ss:$8 sps:$4 sm:$0xff]  }
  0x93   :  { %563 = vmatpush1.bf16.msra.mxu1 %v1646_v39  ;;  %363 = vmatprep.subr.bf16.mxu0 %v1647_v40  ;;  %v1728_v39 = vld [vmem:[#allocation10 + $0xf0] ss:$8 sps:$4 sm:$0xff]   ;;  %v1731_v40 = vld [vmem:[#allocation10 + $0x100] ss:$8 sps:$4 sm:$0xff]  }
  0x94   :  { %564 = vmatprep.subr.bf16.mxu1 %v1649_v41  ;;  %v1733_v41 = vld [vmem:[#allocation10 + $0x104] ss:$8 sps:$4 sm:$0xff]  }
  0x96   :  { %364 = vmatpush1.bf16.msra.mxu0 %v1651_v42  ;;  %v1736_v42 = vld [vmem:[#allocation10 + $0x114] ss:$8 sps:$4 sm:$0xff]  }
  0x97   :  { %565 = vmatpush1.bf16.msra.mxu1 %v1652_v43  ;;  %365 = vmatprep.subr.bf16.mxu0 %v1653_v44  ;;  %v1734_v43 = vld [vmem:[#allocation10 + $0x110] ss:$8 sps:$4 sm:$0xff]   ;;  %v1739_v44 = vld [vmem:[#allocation10 + $0x124] ss:$8 sps:$4 sm:$0xff]  }
  0x98   :  { %566 = vmatprep.subr.bf16.mxu1 %v1655_v45  ;;  %v1737_v45 = vld [vmem:[#allocation10 + $0x120] ss:$8 sps:$4 sm:$0xff]  }
  0x9a   :  { %366 = vmatpush1.bf16.msra.mxu0 %v1657_v47  ;;  %v1740_v47 = vld [vmem:[#allocation10 + $0x130] ss:$8 sps:$4 sm:$0xff]  }
  0x9b   :  { %567 = vmatpush1.bf16.msra.mxu1 %v1658_v48  ;;  %367 = vmatprep.subr.bf16.mxu0 %v1659_v51  ;;  %v1745_v48 = vld [vmem:[#allocation10 + $0x144] ss:$8 sps:$4 sm:$0xff]   ;;  %v1746_v51 = vld [vmem:[#allocation10 + $0x150] ss:$8 sps:$4 sm:$0xff]  }
  0x9c   :  { %568 = vmatprep.subr.bf16.mxu1 %v1661_v53  ;;  %v1749_v53 = vld [vmem:[#allocation10 + $0x160] ss:$8 sps:$4 sm:$0xff]  }
  0x9e   :  { %368 = vmatpush1.bf16.msra.mxu0 %v1663_v54  ;;  %v1754_v54 = vld [vmem:[#allocation10 + $0x174] ss:$8 sps:$4 sm:$0xff]  }
  0x9f   :  { %569 = vmatpush1.bf16.msra.mxu1 %v1664_v55  ;;  %369 = vmatprep.subr.bf16.mxu0 %v1665_v56  ;;  %v1752_v55 = vld [vmem:[#allocation10 + $0x170] ss:$8 sps:$4 sm:$0xff]   ;;  %v1757_v56 = vld [vmem:[#allocation10 + $0x184] ss:$8 sps:$4 sm:$0xff]  }
  0xa0   :  { %570 = vmatprep.subr.bf16.mxu1 %v1667_v57  ;;  %v1755_v57 = vld [vmem:[#allocation10 + $0x180] ss:$8 sps:$4 sm:$0xff]  }
  0xa2   :  { %370 = vmatpush1.bf16.msra.mxu0 %v1669_v58  ;;  %v1760_v58 = vld [vmem:[#allocation10 + $0x194] ss:$8 sps:$4 sm:$0xff]  }
  0xa3   :  { %571 = vmatpush1.bf16.msra.mxu1 %v1670_v59  ;;  %371 = vmatprep.subr.bf16.mxu0 %v1671_v60  ;;  %v1758_v59 = vld [vmem:[#allocation10 + $0x190] ss:$8 sps:$4 sm:$0xff]   ;;  %v1763_v60 = vld [vmem:[#allocation10 + $0x1a4] ss:$8 sps:$4 sm:$0xff]  }
  0xa4   :  { %572 = vmatprep.subr.bf16.mxu1 %v1673_v61  ;;  %v1761_v61 = vld [vmem:[#allocation10 + $0x1a0] ss:$8 sps:$4 sm:$0xff]  }
  0xa6   :  { %372 = vmatpush1.bf16.msra.mxu0 %v1675_v62  ;;  %v1766_v62 = vld [vmem:[#allocation10 + $0x1b4] ss:$8 sps:$4 sm:$0xff]  }
  0xa7   :  { %573 = vmatpush1.bf16.msra.mxu1 %v1676_v63  ;;  %373 = vmatprep.subr.bf16.mxu0 %v1677_v0  ;;  %v1764_v63 = vld [vmem:[#allocation10 + $0x1b0] ss:$8 sps:$4 sm:$0xff]   ;;  %v1769_v0 = vld [vmem:[#allocation10 + $0x1c4] ss:$8 sps:$4 sm:$0xff]  }
  0xa8   :  { %574 = vmatprep.subr.bf16.mxu1 %v1679_v1  ;;  %v1767_v1 = vld [vmem:[#allocation10 + $0x1c0] ss:$8 sps:$4 sm:$0xff]  }
  0xaa   :  { %374 = vmatpush1.bf16.msra.mxu0 %v1681_v2  ;;  %v1772_v2 = vld [vmem:[#allocation10 + $0x1d4] ss:$8 sps:$4 sm:$0xff]  }
  0xab   :  { %575 = vmatpush1.bf16.msra.mxu1 %v1682_v3  ;;  %807 = vmatprep.subr.bf16.mxu0 %v1685_v6  ;;  %v1770_v3 = vld [vmem:[#allocation10 + $0x1d0] ss:$8 sps:$4 sm:$0xff]   ;;  %v2143_v6 = vsub.s32 0, %v588_v5 }
  0xac   :  { %1058 = vmatprep.subr.bf16.mxu1 %v1733_v41  ;;  %v1796_v41 = vld [vmem:[#allocation11 + $0x54] ss:$8 sps:$4 sm:$0xff]  }
  0xad   :  { %376 = vmatmul.mubr.bf16.vlgmr.msra.gmra.mrb[0].mxu0 %v149_v8  ;;  %v2148_v8 = vsub.s32 1, %v588_v5 }
  0xae   :  { %577 = vmatmul.mubr.bf16.vlgmr.msra.gmra.mrb[0].mxu1 %v113_v9  ;;  %808 = vmatpush1.bf16.msra.mxu0 %v1683_v7  ;;  %v585_v7 = vld [vmem:[%s2184_s4] sm:$0x3] }
  0xaf   :  { %809 = vmatprep.subr.bf16.mxu0 %v1688_v10  ;;  %1059 = vmatpush1.bf16.msra.mxu1 %v1731_v40  ;;  %v590_v9 = vrot.slane %v585_v7, %v2143_v6  ;;  %v1791_v40 = vld [vmem:[#allocation11 + $0x40] ss:$8 sps:$4 sm:$0xff]  }
  0xb0   :  { %1060 = vmatprep.subr.bf16.mxu1 %v1736_v42  ;;  %v1794_v42 = vld [vmem:[#allocation11 + $0x50] ss:$8 sps:$4 sm:$0xff]  }
  0xb2   :  { %810 = vmatpush1.bf16.msra.mxu0 %v1686_v11 }
  0xb3   :  { %811 = vmatprep.subr.bf16.mxu0 %v1691_v12  ;;  %1061 = vmatpush1.bf16.msra.mxu1 %v1734_v43  ;;  %v594_v12 = vrot.slane %v585_v7, %v2148_v8  ;;  %v1799_v43 = vld [vmem:[#allocation11 + $0x64] ss:$8 sps:$4 sm:$0xff]  }
  0xb4   :  { %1062 = vmatprep.subr.bf16.mxu1 %v1739_v44  ;;  %v1797_v44 = vld [vmem:[#allocation11 + $0x60] ss:$8 sps:$4 sm:$0xff]  }
  0xb6   :  { %812 = vmatpush1.bf16.msra.mxu0 %v1689_v13 }
  0xb7   :  { %813 = vmatprep.subr.bf16.mxu0 %v1694_v14  ;;  %1063 = vmatpush1.bf16.msra.mxu1 %v1737_v45  ;;  %v1802_v45 = vld [vmem:[#allocation11 + $0x74] ss:$8 sps:$4 sm:$0xff]  }
  0xb8   :  { %1064 = vmatprep.subr.bf16.mxu1 %v1742_v46  ;;  %v1800_v46 = vld [vmem:[#allocation11 + $0x70] ss:$8 sps:$4 sm:$0xff]  }
  0xba   :  { %814 = vmatpush1.bf16.msra.mxu0 %v1692_v15 }
  0xbb   :  { %815 = vmatprep.subr.bf16.mxu0 %v1697_v16  ;;  %1065 = vmatpush1.bf16.msra.mxu1 %v1740_v47  ;;  %v1805_v47 = vld [vmem:[#allocation11 + $0x84] ss:$8 sps:$4 sm:$0xff]  }
  0xbc   :  { %1066 = vmatprep.subr.bf16.mxu1 %v1745_v48  ;;  %v1803_v48 = vld [vmem:[#allocation11 + $0x80] ss:$8 sps:$4 sm:$0xff]  }
  0xbe   :  { %816 = vmatpush1.bf16.msra.mxu0 %v1695_v17 }
  0xbf   :  { %817 = vmatprep.subr.bf16.mxu0 %v1700_v18  ;;  %1067 = vmatpush1.bf16.msra.mxu1 %v1743_v49  ;;  %v1808_v49 = vld [vmem:[#allocation11 + $0x94] ss:$8 sps:$4 sm:$0xff]  }
  0xc0   :  { %1068 = vmatprep.subr.bf16.mxu1 %v1748_v50  ;;  %v1806_v50 = vld [vmem:[#allocation11 + $0x90] ss:$8 sps:$4 sm:$0xff]  }
  0xc2   :  { %818 = vmatpush1.bf16.msra.mxu0 %v1698_v19 }
  0xc3   :  { %819 = vmatprep.subr.bf16.mxu0 %v1703_v20  ;;  %1069 = vmatpush1.bf16.msra.mxu1 %v1746_v51  ;;  %v1811_v51 = vld [vmem:[#allocation11 + $0xa4] ss:$8 sps:$4 sm:$0xff]  }
  0xc4   :  { %1070 = vmatprep.subr.bf16.mxu1 %v1751_v52  ;;  %v1809_v52 = vld [vmem:[#allocation11 + $0xa0] ss:$8 sps:$4 sm:$0xff]  }
  0xc6   :  { %820 = vmatpush1.bf16.msra.mxu0 %v1701_v21 }
  0xc7   :  { %821 = vmatprep.subr.bf16.mxu0 %v1706_v22  ;;  %1071 = vmatpush1.bf16.msra.mxu1 %v1749_v53  ;;  %v1814_v53 = vld [vmem:[#allocation11 + $0xb4] ss:$8 sps:$4 sm:$0xff]  }
  0xc8   :  { %1072 = vmatprep.subr.bf16.mxu1 %v1754_v54  ;;  %v1812_v54 = vld [vmem:[#allocation11 + $0xb0] ss:$8 sps:$4 sm:$0xff]  }
  0xca   :  { %822 = vmatpush1.bf16.msra.mxu0 %v1704_v23 }
  0xcb   :  { %823 = vmatprep.subr.bf16.mxu0 %v1709_v24  ;;  %1073 = vmatpush1.bf16.msra.mxu1 %v1752_v55  ;;  %v1817_v55 = vld [vmem:[#allocation11 + $0xc4] ss:$8 sps:$4 sm:$0xff]  }
  0xcc   :  { %1074 = vmatprep.subr.bf16.mxu1 %v1757_v56  ;;  %v1815_v56 = vld [vmem:[#allocation11 + $0xc0] ss:$8 sps:$4 sm:$0xff]  }
  0xce   :  { %824 = vmatpush1.bf16.msra.mxu0 %v1707_v25 }
  0xcf   :  { %825 = vmatprep.subr.bf16.mxu0 %v1712_v26  ;;  %1075 = vmatpush1.bf16.msra.mxu1 %v1755_v57  ;;  %v1820_v57 = vld [vmem:[#allocation11 + $0xd4] ss:$8 sps:$4 sm:$0xff]  }
  0xd0   :  { %1076 = vmatprep.subr.bf16.mxu1 %v1760_v58  ;;  %v1818_v58 = vld [vmem:[#allocation11 + $0xd0] ss:$8 sps:$4 sm:$0xff]  }
  0xd2   :  { %826 = vmatpush1.bf16.msra.mxu0 %v1710_v27  ;;  %v1775_v27 = vld [vmem:[#allocation10 + $0x1e4] ss:$8 sps:$4 sm:$0xff]  }
  0xd3   :  { %827 = vmatprep.subr.bf16.mxu0 %v1715_v28  ;;  %1077 = vmatpush1.bf16.msra.mxu1 %v1758_v59  ;;  %v1773_v28 = vld [vmem:[#allocation10 + $0x1e0] ss:$8 sps:$4 sm:$0xff]  }
  0xd4   :  { %1078 = vmatprep.subr.bf16.mxu1 %v1763_v60  ;;  %v635_v59 = vld [vmem:[%s2186_s6] sm:$0x3] }
  0xd5   :  { %v640_v60 = vrot.slane %v635_v59, %v2143_v6 }
  0xd6   :  { %828 = vmatpush1.bf16.msra.mxu0 %v1713_v29  ;;  %v1778_v29 = vld [vmem:[#allocation10 + $0x1f4] ss:$8 sps:$4 sm:$0xff]  }
  0xd7   :  { %829 = vmatprep.subr.bf16.mxu0 %v1718_v30  ;;  %1079 = vmatpush1.bf16.msra.mxu1 %v1761_v61  ;;  %v1776_v30 = vld [vmem:[#allocation10 + $0x1f0] ss:$8 sps:$4 sm:$0xff]   ;;  %v644_v61 = vrot.slane %v635_v59, %v2148_v8 }
  0xd8   :  { %1080 = vmatprep.subr.bf16.mxu1 %v1766_v62 }
  0xda   :  { %830 = vmatpush1.bf16.msra.mxu0 %v1716_v31  ;;  %v1779_v31 = vld [vmem:[#allocation11] ss:$8 sps:$4 sm:$0xff]  }
  0xdb   :  { %831 = vmatprep.subr.bf16.mxu0 %v1721_v32  ;;  %1081 = vmatpush1.bf16.msra.mxu1 %v1764_v63  ;;  %v1781_v32 = vld [vmem:[#allocation11 + $0x4] ss:$8 sps:$4 sm:$0xff]  }
  0xdc   :  { %1082 = vmatprep.subr.bf16.mxu1 %v1769_v0 }
  0xde   :  { %832 = vmatpush1.bf16.msra.mxu0 %v1719_v33  ;;  %v1784_v33 = vld [vmem:[#allocation11 + $0x14] ss:$8 sps:$4 sm:$0xff]  }
  0xdf   :  { %833 = vmatprep.subr.bf16.mxu0 %v1724_v34  ;;  %1083 = vmatpush1.bf16.msra.mxu1 %v1767_v1  ;;  %v1782_v34 = vld [vmem:[#allocation11 + $0x10] ss:$8 sps:$4 sm:$0xff]  }
  0xe0   :  { %1084 = vmatprep.subr.bf16.mxu1 %v1772_v2 }
  0xe2   :  { %834 = vmatpush1.bf16.msra.mxu0 %v1722_v35  ;;  %v1787_v35 = vld [vmem:[#allocation11 + $0x24] ss:$8 sps:$4 sm:$0xff]  }
  0xe3   :  { %835 = vmatprep.subr.bf16.mxu0 %v1727_v36  ;;  %1085 = vmatpush1.bf16.msra.mxu1 %v1770_v3  ;;  %v1785_v36 = vld [vmem:[#allocation11 + $0x20] ss:$8 sps:$4 sm:$0xff]  }
  0xe4   :  { %1086 = vmatprep.subr.bf16.mxu1 %v1775_v27 }
  0xe6   :  { %836 = vmatpush1.bf16.msra.mxu0 %v1725_v37  ;;  %v1790_v37 = vld [vmem:[#allocation11 + $0x34] ss:$8 sps:$4 sm:$0xff]  }
  0xe7   :  { %837 = vmatprep.subr.bf16.mxu0 %v1730_v38  ;;  %1087 = vmatpush1.bf16.msra.mxu1 %v1773_v28  ;;  %v1788_v38 = vld [vmem:[#allocation11 + $0x30] ss:$8 sps:$4 sm:$0xff]   ;;  %v1135_v28 = vld [vmem:[%s2188_s8] sm:$0x3] }
  0xe8   :  { %1088 = vmatprep.subr.bf16.mxu1 %v1778_v29  ;;  %v1140_v29 = vrot.slane %v1135_v28, %v2143_v6 }
  0xea   :  { %838 = vmatpush1.bf16.msra.mxu0 %v1728_v39  ;;  %v1793_v39 = vld [vmem:[#allocation11 + $0x44] ss:$8 sps:$4 sm:$0xff]  }
  0xeb   :  { %1089 = vmatpush1.bf16.msra.mxu1 %v1776_v30  ;;  %1307 = vmatprep.subr.bf16.mxu0 %v1781_v32  ;;  %v1144_v30 = vrot.slane %v1135_v28, %v2148_v8 }
 0x180   :  { %v377_v10 = vpop.f32.mrb[0].mxu0 }
 0x181   :  { %v578_v11 = vpop.f32.mrb[0].mxu1  ;;  %v379_v14 = vpop.f32.mrb[1].mxu0 }
 0x182   :  { %v579_v13 = vadd.f32 %v578_v11, %v377_v10  ;;  %v580_v15 = vpop.f32.mrb[1].mxu1  ;;  %v381_v17 = vpop.f32.mrb[2].mxu0  ;;  %v1823_v11 = vld [vmem:[#allocation11 + $0xe4] ss:$8 sps:$4 sm:$0xff]  }
 0x183   :  { %v581_v16 = vadd.f32 %v580_v15, %v379_v14  ;;  %v582_v18 = vpop.f32.mrb[2].mxu1  ;;  %v382_v20 = vpop.f32.mrb[3].mxu0  ;;  %v1824_v14 = vld [vmem:[#allocation11 + $0xf0] ss:$8 sps:$4 sm:$0xff]   ;;  %v1513_v15 = vld [vmem:[%s2186_s6 + $0x2] sm:$0x3] }
 0x184   :  { %v597_v19 = vadd.f32 %v590_v9, %v579_v13  ;;  %v583_v21 = vpop.f32.mrb[3].mxu1  ;;  %v1826_v13 = vld [vmem:[#allocation11 + $0xf4] ss:$8 sps:$4 sm:$0xff]   ;;  %v895_v17 = vrot.slane %v1513_v15, %v2148_v8  ;;  %s2007_s6 = smov [#allocation13]  }
 0x185   :  { %v598_v22 = vadd.f32 %v594_v12, %v581_v16  ;;  %v1821_v12 = vld [vmem:[#allocation11 + $0xe0] ss:$8 sps:$4 sm:$0xff]   ;;  %v891_v16 = vrot.slane %v1513_v15, %v2143_v6  ;;  %s1405_s8 = sshll.u32 %s2007_s6, 4  ;;  %s1406_s8 = int_to_ptr.vmem [resolvable:$true] %s1405_s8 }
 0x186   :  { %v599_v23 = vmax.f32 %v597_v19, 0.0  ;;  %s1967_s19 = scalar_lea.vmem %s1406_s8, 256  ;;  %p1972_p7 = scmp.lt.s32.totalorder %s1406_s8, %s1406_s8 }
 0x187   :  { %v600_v24 = vmax.f32 %v598_v22, 0.0  ;;  %p1968_p6 = scmp.ne.s32.totalorder %s1406_s8, %s1967_s19  ;;  %p1973_p8 = scmp.lt.s32.totalorder %s1967_s19, %s1967_s19 }
 0x188   :  { %v601_v26 = vpack.c.bf16 %v599_v23, %v599_v23 }
 0x189   :  { %v602_v25 = vpack.c.bf16 %v600_v24, %v600_v24  ;;  %p1974_p9 = por %p1973_p8, %p1972_p7 }
 0x18b   :  { %839 = vmatprep.mubr.bf16.mxu0 %v602_v25  ;;  %p1975_p10 = pnand %p1974_p9, %p1968_p6 }
 0x18c   :  { %840 = vmatmul.mubr.bf16.vlgmr.msra.gmra.mrb[4].mxu0 %v601_v26 }
 0x18d   :  { %1308 = vmatpush1.bf16.msra.mxu0 %v1779_v31 }
 0x18e   :  { %1309 = vmatprep.subr.bf16.mxu0 %v1784_v33 }
 0x191   :  { %1310 = vmatpush1.bf16.msra.mxu0 %v1782_v34 }
 0x192   :  { %1311 = vmatprep.subr.bf16.mxu0 %v1787_v35 }
 0x195   :  { %1312 = vmatpush1.bf16.msra.mxu0 %v1785_v36 }
 0x196   :  { %1313 = vmatprep.subr.bf16.mxu0 %v1790_v37 }
 0x199   :  { %1314 = vmatpush1.bf16.msra.mxu0 %v1788_v38 }
 0x19a   :  { %1315 = vmatprep.subr.bf16.mxu0 %v1793_v39 }
 0x19d   :  { %1316 = vmatpush1.bf16.msra.mxu0 %v1791_v40 }
 0x19e   :  { %1317 = vmatprep.subr.bf16.mxu0 %v1796_v41 }
 0x1a1   :  { %1318 = vmatpush1.bf16.msra.mxu0 %v1794_v42 }
 0x1a2   :  { %1319 = vmatprep.subr.bf16.mxu0 %v1799_v43 }
 0x1a5   :  { %1320 = vmatpush1.bf16.msra.mxu0 %v1797_v44 }
 0x1a6   :  { %1321 = vmatprep.subr.bf16.mxu0 %v1802_v45 }
 0x1a9   :  { %1322 = vmatpush1.bf16.msra.mxu0 %v1800_v46 }
 0x1aa   :  { %1323 = vmatprep.subr.bf16.mxu0 %v1805_v47 }
 0x1ad   :  { %1324 = vmatpush1.bf16.msra.mxu0 %v1803_v48 }
 0x1ae   :  { %1325 = vmatprep.subr.bf16.mxu0 %v1808_v49  ;;  %v1349_v49 = vand.u32 127, %v587_v4 }
 0x1b0   :  { %v1351_v59 = vand.u32 31, %v1349_v49 }
 0x1b1   :  { %1326 = vmatpush1.bf16.msra.mxu0 %v1806_v50 }
 0x1b2   :  { %1327 = vmatprep.subr.bf16.mxu0 %v1811_v51  ;;  %vm1393_vm4 = vcmp.lt.s32.totalorder %v1351_v59, 16 }
 0x1b5   :  { %1328 = vmatpush1.bf16.msra.mxu0 %v1809_v52 }
 0x1b6   :  { %1329 = vmatprep.subr.bf16.mxu0 %v1814_v53 }
 0x1b9   :  { %1330 = vmatpush1.bf16.msra.mxu0 %v1812_v54  ;;  %v1350_v54 = vadd.s32 128, %v1349_v49 }
 0x1ba   :  { %1331 = vmatprep.subr.bf16.mxu0 %v1817_v55 }
 0x1bd   :  { %1332 = vmatpush1.bf16.msra.mxu0 %v1815_v56 }
 0x1be   :  { %1333 = vmatprep.subr.bf16.mxu0 %v1820_v57 }
 0x1c1   :  { %1334 = vmatpush1.bf16.msra.mxu0 %v1818_v58 }
 0x1c2   :  { %1335 = vmatprep.subr.bf16.mxu0 %v1823_v11 }
 0x1c5   :  { %1336 = vmatpush1.bf16.msra.mxu0 %v1821_v12 }
 0x1c6   :  { %1337 = vmatprep.subr.bf16.mxu0 %v1826_v13 }
 0x1c9   :  { %1338 = vmatpush1.bf16.msra.mxu0 %v1824_v14 }
 0x25f   :  { %v841_v62 = vpop.f32.mrb[4].mxu0 }
 0x260   :  { %v842_v63 = vadd.f32 %v841_v62, %v640_v60  ;;  %v843_v0 = vpop.f32.mrb[5].mxu0 }
 0x261   :  { %v844_v1 = vadd.f32 %v843_v0, %v644_v61  ;;  %v845_v2 = vpop.f32.mrb[6].mxu0 }
 0x262   :  { %v848_v3 = vmax.f32 %v842_v63, 0.0  ;;  %v846_v5 = vpop.f32.mrb[7].mxu0 }
 0x263   :  { %v849_v7 = vmax.f32 %v844_v1, 0.0  ;;  %v1352_v1 = vand.u32 31, %v1350_v54 }
 0x264   :  { %v850_v10 = vpack.c.bf16 %v848_v3, %v848_v3 }
 0x265   :  { %v851_v9 = vpack.c.bf16 %v849_v7, %v849_v7  ;;  %vm1394_vm5 = vcmp.lt.s32.totalorder %v1352_v1, 16 }
 0x267   :  { %1090 = vmatprep.mubr.bf16.mxu1 %v851_v9 }
 0x268   :  { %1091 = vmatmul.mubr.bf16.vlgmr.msra.gmra.mrb[4].mxu1 %v850_v10 }
 0x33b   :  { %v1092_v18 = vpop.f32.mrb[4].mxu1 }
 0x33c   :  { %v1093_v19 = vadd.f32 %v1092_v18, %v891_v16  ;;  %v1094_v20 = vpop.f32.mrb[5].mxu1 }
 0x33d   :  { %v1095_v21 = vadd.f32 %v1094_v20, %v895_v17  ;;  %v1096_v22 = vpop.f32.mrb[6].mxu1 }
 0x33e   :  { %v1099_v23 = vmax.f32 %v1093_v19, 0.0  ;;  %v1097_v24 = vpop.f32.mrb[7].mxu1 }
 0x33f   :  { %v1100_v25 = vmax.f32 %v1095_v21, 0.0 }
 0x340   :  { %v1101_v27 = vpack.c.bf16 %v1099_v23, %v1099_v23 }
 0x341   :  { %v1102_v26 = vpack.c.bf16 %v1100_v25, %v1100_v25 }
 0x343   :  { %1339 = vmatprep.mubr.bf16.mxu0 %v1102_v26 }
 0x344   :  { %1340 = vmatmul.mubr.bf16.vlgmr.msra.gmra.mrb[8].mxu0 %v1101_v27 }
 0x417   :  { %v1341_v31 = vpop.f32.mrb[8].mxu0 }
 0x418   :  { %v1342_v32 = vadd.f32 %v1341_v31, %v1140_v29  ;;  %v1343_v33 = vpop.f32.mrb[9].mxu0 }
 0x419   :  { %v1344_v34 = vadd.f32 %v1343_v33, %v1144_v30  ;;  %v1345_v35 = vpop.f32.mrb[10].mxu0 }
 0x41a   :  { %v1353_v36 = vadd.f32 0.55, %v1342_v32  ;;  %v1346_v37 = vpop.f32.mrb[11].mxu0 }
 0x41b   :  { %v1354_v38 = vadd.f32 0.55, %v1344_v34 }
 0x41c   :  { %v1361_v39 = vand.u32 2147483647, %v1353_v36  ;;  %v1355_v60 = vmax.f32 %v1353_v36, 0.0  ;;  %vm1357_vm2 = vcmp.ne.f32.partialorder %v1353_v36, %v1353_v36 }
 0x41d   :  { %v1362_v40 = vand.u32 2147483647, %v1354_v38  ;;  %v1356_v0 = vmax.f32 %v1354_v38, 0.0  ;;  %vm1358_vm3 = vcmp.ne.f32.partialorder %v1354_v38, %v1354_v38 }
 0x41e   :  { %v1363_v41 = vsub.f32 0.0, %v1361_v39 }
 0x41f   :  { %v1364_v42 = vsub.f32 0.0, %v1362_v40 }
 0x420   :  { %v1365_v43 = vmul.f32 1.442695, %v1363_v41 }
 0x421   :  { %v1367_v44 = vmul.f32 1.442695, %v1364_v42 }
 0x422   :  { %1827 = vpow2.f32 %v1365_v43 }
 0x423   :  { %1829 = vpow2.f32 %v1367_v44 }
 0x42c   :  { %v1828_v45 = vpop.eup %1827 }
 0x42d   :  { %v1830_v6 = vpop.eup %1829  ;;  %v1369_v46 = vadd.f32 1.0, %v1828_v45  ;;  %v1372_v47 = vmul.f32 -0.5, %v1828_v45  ;;  %v1375_v51 = vand.u32 2147483647, %v1828_v45 }
 0x42e   :  { %v1378_v8 = vadd.f32 1.0, %v1830_v6  ;;  %v1381_v48 = vmul.f32 -0.5, %v1830_v6  ;;  %v1384_v53 = vand.u32 2147483647, %v1830_v6 }
 0x42f   :  { %1831 = vlog2.f32 %v1369_v46  ;;  %v1373_v50 = vadd.f32 1.0, %v1372_v47  ;;  %vm1376_vm0 = vcmp.lt.f32.partialorder %v1375_v51, 0.0004427343 }
 0x430   :  { %1833 = vlog2.f32 %v1378_v8  ;;  %v1382_v52 = vadd.f32 1.0, %v1381_v48  ;;  %vm1385_vm1 = vcmp.lt.f32.partialorder %v1384_v53, 0.0004427343 }
 0x431   :  { %v1374_v58 = vmul.f32 %v1828_v45, %v1373_v50 }
 0x432   :  { %v1383_v62 = vmul.f32 %v1830_v6, %v1382_v52 }
 0x439   :  { %v1832_v55 = vpop.eup %1831 }
 0x43a   :  { %v1834_v56 = vpop.eup %1833  ;;  %v1371_v57 = vmul.f32 0.6931472, %v1832_v55 }
 0x43b   :  { %v1380_v61 = vmul.f32 0.6931472, %v1834_v56 }
 0x43c   :  { %v1377_v63 = vsel %vm1376_vm0, %v1374_v58, %v1371_v57 }
 0x43d   :  { %v1387_v2 = vadd.f32 %v1377_v63, %v1355_v60  ;;  %v1386_v4 = vsel %vm1385_vm1, %v1383_v62, %v1380_v61 }
 0x43e   :  { %v1388_v3 = vadd.f32 %v1386_v4, %v1356_v0 }
 0x43f   :  { %v1389_v5 = vsel %vm1357_vm2, %v1353_v36, %v1387_v2 }
 0x440   :  { %v1390_v7 = vsel %vm1358_vm3, %v1354_v38, %v1388_v3  ;;  %v1391_v9 = vadd.f32 0.1, %v1389_v5 }
 0x441   :  { %v1392_v10 = vadd.f32 0.1, %v1390_v7 }
 0x442   :  { %v1395_v11 = vsel %vm1393_vm4, %v1342_v32, %v1391_v9 }
 0x443   :  { %v1396_v12 = vsel %vm1394_vm5, %v1344_v34, %v1392_v10  ;;  %1397 = vst [vmem:[#allocation13] sm:$0xff] %v1395_v11 }
 0x444   :  { %1398 = vst [vmem:[#allocation13 + $0x8] sm:$0xff] %v1396_v12 }
 0x445   :  { %1978 = shalt.err (!%p1975_p10)
}
 0x446   :  { %s1979_s23 = scalar_lea.hbm %s2189_s9, 256 }
 0x447   :  { %p1980_p11 = scmp.ne.s32.totalorder %s2189_s9, %s1979_s23  ;;  %p1983_p12 = scmp.lt.u32.totalorder %s1979_s23, %s2189_s9 }
 0x449   :  { %p1985_p13 = pnand %p1983_p12, %p1980_p11 }
 0x44b   :  { %1988 = shalt.err (!%p1985_p13)
}
 0x44c   :  { %1408 = dma.vmem_to_hbm [thread:$0]  %s1406_s8, 256, %s2189_s9, [#allocation4]  }
 0x44d   :  { %1997 = dma.done.wait [#allocation4], 256  }
 0x44e   :  { %1998 = vsyncadd [#allocation4], 4294967040 }
 0x44f   :  { %1412 = vsyncpa [#allocation3], 1 }
 0x450   :  { %1413 = vsyncpa [#allocation6], 1 }
 0x451   :  { %1414 = vsyncpa [#allocation9], 1 }
 0x452   :  { %1415 = vsyncpa [#allocation12], 1 }
 0x453   :  { %1416 = vsyncpa [#allocation4], 1 }

</bundles_post_ra>
